<compile_context>
chip_gen: v7x
topology: tpu7x:2x2x1
jax: 0.10.0
libtpu: 0.0.40
codegen_flags: <defaults>
</compile_context>

<pallas_src>
import jax
import jax.numpy as jnp
from jax.experimental import pallas as pl
from jax.experimental.pallas import tpu as pltpu


def _round_up(a, b):
    return ((a + b - 1) // b) * b


# ----------------------------------------------------------------------------
# Pallas kernel: one lane-dense tile of the collapsed MLP + masked sq-err sum
# ----------------------------------------------------------------------------
def fullmlp_kernel(xa_ref, xb_ref, wa_ref, wb_ref, b_ref, nvalid_ref, vals_ref,
                   out_ref, psum_ref):
    """
    xa_ref     : (rep_dim, TN)  features of pair-node 0, batch on lanes (VMEM, bf16/f32)
    xb_ref     : (rep_dim, TN)  features of pair-node 1                 (VMEM, bf16/f32)
    wa_ref     : (rep_dim, 1)   first half of collapsed weight column   (VMEM, resident)
    wb_ref     : (rep_dim, 1)   second half of collapsed weight column  (VMEM, resident)
    b_ref      : (1,)  f32      collapsed bias  b1 @ w2 + b2            (SMEM scalar)
    nvalid_ref : (1,)  i32      number of real (unpadded) pairs         (SMEM scalar)
    vals_ref   : (1, TN) f32    gathered targets (padded lanes don't-care)
    out_ref    : (1, TN) f32    sigmoid(x @ w_eff + b_eff)
    psum_ref   : (1, 128) f32   per-tile masked sum of squared error (scalar splat)
    """
    tn = out_ref.shape[-1]
    xa = xa_ref[...].astype(jnp.float32)
    xb = xb_ref[...].astype(jnp.float32)
    # Collapsed fc1+fc2 matvec: VPU multiply + cross-sublane (XLU) reduce.
    # Output width is 1, so the MXU would be <1% utilized -- avoid it entirely.
    o = (jnp.sum(xa * wa_ref[...], axis=0, keepdims=True)
         + jnp.sum(xb * wb_ref[...], axis=0, keepdims=True)
         + b_ref[0])                                           # (1, TN)
    # Sigmoid: exp hits the EUP; exact reciprocal keeps 1e-5 bit-accuracy.
    p = pl.reciprocal(1.0 + jnp.exp(-o))                       # (1, TN)
    out_ref[...] = p.astype(out_ref.dtype)

    # Masked per-tile partial sum of the squared error (padded lanes excluded),
    # instead of a full-width HBM writeback + separate XLA reduction.
    col = (jax.lax.broadcasted_iota(jnp.int32, (1, tn), 1)
           + pl.program_id(0) * tn)
    diff = p - vals_ref[...]
    sq = jnp.where(col < nvalid_ref[0], diff * diff, 0.0)
    psum_ref[...] = jnp.full((1, 128), jnp.sum(sq), dtype=psum_ref.dtype)


def fullmlp_pallas(xa, xb, wa, wb, b_eff, n_valid, vals2d, tn):
    """xa/xb: (rep_dim, N_pad); wa/wb: (rep_dim, 1) f32; b_eff: (1,) f32;
    n_valid: (1,) i32; vals2d: (1, N_pad) f32."""
    rep_dim, n_pad = xa.shape
    num_tiles = n_pad // tn

    out2d, psum2d = pl.pallas_call(
        fullmlp_kernel,
        out_shape=(
            jax.ShapeDtypeStruct((1, n_pad), jnp.float32),          # sigmoid output
            jax.ShapeDtypeStruct((1, num_tiles * 128), jnp.float32),  # per-tile sq-err sums
        ),
        grid_spec=pltpu.PrefetchScalarGridSpec(
            num_scalar_prefetch=0,
            grid=(num_tiles,),
            in_specs=[
                pl.BlockSpec((rep_dim, tn), lambda i: (0, i)),      # x, node-a half
                pl.BlockSpec((rep_dim, tn), lambda i: (0, i)),      # x, node-b half
                # Constant block index -> fetched once, kept resident in VMEM
                # (no per-step re-DMA).
                pl.BlockSpec((rep_dim, 1), lambda i: (0, 0)),       # w, node-a half
                pl.BlockSpec((rep_dim, 1), lambda i: (0, 0)),       # w, node-b half
                pl.BlockSpec(memory_space=pltpu.MemorySpace.SMEM),  # bias scalar
                pl.BlockSpec(memory_space=pltpu.MemorySpace.SMEM),  # n_valid scalar
                pl.BlockSpec((1, tn), lambda i: (0, i)),            # targets
            ],
            out_specs=[
                pl.BlockSpec((1, tn), lambda i: (0, i)),
                pl.BlockSpec((1, 128), lambda i: (0, i)),
            ],
        ),
        compiler_params=pltpu.CompilerParams(
            dimension_semantics=("parallel",)),                     # megacore on v7x
    )(xa, xb, wa, wb, b_eff, n_valid, vals2d)
    return out2d, psum2d


# ----------------------------------------------------------------------------
# Glue matching the PyTorch forward
# ----------------------------------------------------------------------------
def convert_indices(input_pairs, cum_pos):
    # TODO(synk): convert_indices is not defined in the provided source; modeled
    # as a global->local offset shift by cum_pos (identity when cum_pos == 0).
    return input_pairs - cum_pos


def fullmlp_forward(params, input_pairs, values, cum_pos, full_reps,
                    input_size_mlp, *, x_dtype=jnp.bfloat16, use_kernel=None):
    w1, b1, w2, b2 = params
    pairs = convert_indices(input_pairs, cum_pos)              # (N, 2) int32
    n = pairs.shape[0]
    rep_dim = full_reps.shape[1]
    assert input_size_mlp == 2 * rep_dim

    if n == 0:                                                 # degenerate batch guard
        z = jnp.zeros((0,), jnp.float32)
        return jnp.float32(0.0), z, z

    rows, cols = pairs[:, 0], pairs[:, 1]
    value_pairs = values[rows, cols].astype(jnp.float32)       # (N,)

    # Small-N fast path: custom-call boundary + gathers dominate; fused XLA wins.
    if use_kernel is None:
        use_kernel = n >= 4096
    if not use_kernel:
        x = full_reps[pairs].reshape(n, input_size_mlp)
        logits = (x @ w1 + b1) @ w2 + b2
        output_fc = jax.nn.sigmoid(logits)[:, 0]
        loss = jnp.mean((output_fc - value_pairs) ** 2)
        return loss, value_pairs, output_fc

    # Collapse the two linear layers (exact identity; no nonlinearity between):
    # a single 32x32x1 matmul in the wrapper, done once per call.
    w_eff = (w1 @ w2).astype(jnp.float32)                      # (D_in, 1)
    b_eff = (b1 @ w2 + b2).reshape(1).astype(jnp.float32)      # (1,)
    wa, wb = w_eff[:rep_dim], w_eff[rep_dim:]                  # (rep_dim, 1) each

    # Tile width: big enough to amortize the ~0.35us/step overhead (up to 8192
    # lanes: 2 * 8192 * rep_dim * 2B bf16 = 512 KiB/step, trivial vs VMEM), but
    # capped near N_pad/2 so the "parallel" grid has >= 2 steps for v7x megacore.
    n128 = _round_up(n, 128)
    tn = max(128, min(8192, _round_up((n128 + 1) // 2, 128)))
    n_pad = _round_up(n, tn)

    # Pad the (tiny) index vectors, not the big slab: the column-wise gathers
    # then emit the already-padded, lane-dense (rep_dim, N_pad) slabs directly,
    # with no separate transpose or pad pass over the dominant array.
    rows_p = jnp.pad(rows, (0, n_pad - n))
    cols_p = jnp.pad(cols, (0, n_pad - n))
    repsT = full_reps.T.astype(x_dtype)                        # (rep_dim, num_nodes), tiny
    xa = jnp.take(repsT, rows_p, axis=1)                       # (rep_dim, N_pad)
    xb = jnp.take(repsT, cols_p, axis=1)                       # (rep_dim, N_pad)
    vals2d = jnp.pad(value_pairs, (0, n_pad - n)).reshape(1, n_pad)
    n_valid = jnp.full((1,), n, jnp.int32)

    out2d, psum2d = fullmlp_pallas(xa, xb, wa, wb, b_eff, n_valid, vals2d, tn)

    output_fc = out2d[0, :n]                                   # (N,)
    num_tiles = n_pad // tn
    loss = jnp.sum(psum2d.reshape(num_tiles, 128)[:, 0]) / n   # MSE over real N only
    return loss, value_pairs, output_fc


# ----------------------------------------------------------------------------
# Main
# ----------------------------------------------------------------------------
if __name__ == "__main__":
    # cfg: rep_dim=16 -> input_size_mlp=32, hidden_size_fc2=32, output_size_mlp=1
    num_nodes = 16
    rep_dim = 16
    input_size_mlp = 2 * rep_dim      # 32
    hidden_size_fc2 = 32
    output_size_mlp = 1
    n_pairs = 8

    key = jax.random.PRNGKey(0)
    k1, k2, k3, k4, k5, k6, k7 = jax.random.split(key, 7)

    # Deterministic parameter init (PyTorch Linear-like uniform bounds).
    bound1 = 1.0 / jnp.sqrt(input_size_mlp)
    w1 = jax.random.uniform(k1, (input_size_mlp, hidden_size_fc2),
                            jnp.float32, -bound1, bound1)
    b1 = jax.random.uniform(k2, (hidden_size_fc2,), jnp.float32, -bound1, bound1)
    bound2 = 1.0 / jnp.sqrt(hidden_size_fc2)
    w2 = jax.random.uniform(k3, (hidden_size_fc2, output_size_mlp),
                            jnp.float32, -bound2, bound2)
    b2 = jax.random.uniform(k4, (output_size_mlp,), jnp.float32, -bound2, bound2)
    params = (w1, b1, w2, b2)

    # Inputs.
    input_pairs = jax.random.randint(k5, (n_pairs, 2), 0, num_nodes, jnp.int32)
    values = jax.random.uniform(k6, (num_nodes, num_nodes), jnp.float32)
    full_reps = jax.random.normal(k7, (num_nodes, rep_dim), jnp.float32)
    cum_pos = jnp.int32(0)

    # Reference in plain JAX with the ORIGINAL two-layer formulation.
    x_ref = full_reps[input_pairs].reshape(-1, input_size_mlp)
    logits_ref = (x_ref @ w1 + b1) @ w2 + b2
    ref_out = jax.nn.sigmoid(logits_ref)[:, 0]
    ref_vals = values[input_pairs[:, 0], input_pairs[:, 1]]
    ref_loss = jnp.mean((ref_out - ref_vals) ** 2)

    # 1) Kernel path, f32 input storage: tight tolerance vs. the reference.
    loss32, vals32, out32 = fullmlp_forward(
        params, input_pairs, values, cum_pos, full_reps, input_size_mlp,
        x_dtype=jnp.float32, use_kernel=True)
    jax.block_until_ready((loss32, vals32, out32))
    assert out32.shape == (n_pairs,), "output shape mismatch"
    assert jnp.allclose(vals32, ref_vals), "value_pairs mismatch"
    assert jnp.allclose(out32, ref_out, atol=1e-5), "f32 output mismatch"
    assert jnp.allclose(loss32, ref_loss, atol=1e-5), "f32 loss mismatch"

    # 2) Kernel path, bf16 input storage (default perf config; halves HBM reads).
    loss16, vals16, out16 = fullmlp_forward(
        params, input_pairs, values, cum_pos, full_reps, input_size_mlp,
        x_dtype=jnp.bfloat16, use_kernel=True)
    jax.block_until_ready((loss16, vals16, out16))
    assert jnp.allclose(out16, ref_out, atol=1e-2), "bf16 output mismatch"
    assert jnp.allclose(loss16, ref_loss, atol=1e-2), "bf16 loss mismatch"

    # 3) Auto path: at this tiny N the plain-JAX fast path is used.
    loss_fp, vals_fp, out_fp = fullmlp_forward(
        params, input_pairs, values, cum_pos, full_reps, input_size_mlp)
    jax.block_until_ready((loss_fp, vals_fp, out_fp))
    assert jnp.allclose(out_fp, ref_out, atol=1e-6), "fast-path output mismatch"
    assert jnp.allclose(loss_fp, ref_loss, atol=1e-6), "fast-path loss mismatch"

    print("KERNEL_OK")
</pallas_src>

<mosaic_0001>
module attributes {stable_mosaic.version = 11 : i64} {
  func.func @fullmlp_kernel(%arg0: i32, %arg1: memref<16x128xf32, #tpu.memory_space<vmem>>, %arg2: memref<16x128xf32, #tpu.memory_space<vmem>>, %arg3: memref<16x1xf32, #tpu.memory_space<vmem>>, %arg4: memref<16x1xf32, #tpu.memory_space<vmem>>, %arg5: memref<1xf32, #tpu.memory_space<smem>>, %arg6: memref<1xi32, #tpu.memory_space<smem>>, %arg7: memref<1x128xf32, #tpu.memory_space<vmem>>, %arg8: memref<1x128xf32, #tpu.memory_space<vmem>>, %arg9: memref<1x128xf32, #tpu.memory_space<vmem>>) attributes {dimension_semantics = [#tpu.dimension_semantics<parallel>], iteration_bounds = array<i64: 1>, scalar_prefetch = 0 : i64, scratch_operands = 0 : i64, tpu.core_type = #tpu.core_type<tc>, window_params = [{transform_indices = @transform_0, window_bounds = array<i64: 16, 128>}, {transform_indices = @transform_1, window_bounds = array<i64: 16, 128>}, {pipeline_mode = #tpu.pipeline_mode<synchronous>, transform_indices = @transform_2, window_bounds = array<i64: 16, 1>}, {pipeline_mode = #tpu.pipeline_mode<synchronous>, transform_indices = @transform_3, window_bounds = array<i64: 16, 1>}, {transform_indices = @transform_4, window_bounds = array<i64: 1>}, {transform_indices = @transform_5, window_bounds = array<i64: 1>}, {transform_indices = @transform_6, window_bounds = array<i64: 1, 128>}, {transform_indices = @transform_7, window_bounds = array<i64: 1, 128>}, {transform_indices = @transform_8, window_bounds = array<i64: 1, 128>}]} {
    %c0 = arith.constant 0 : index
    %c0_0 = arith.constant 0 : index
    %0 = vector.load %arg1[%c0, %c0_0] : memref<16x128xf32, #tpu.memory_space<vmem>>, vector<16x128xf32>
    %c0_1 = arith.constant 0 : index
    %c0_2 = arith.constant 0 : index
    %1 = vector.load %arg2[%c0_1, %c0_2] : memref<16x128xf32, #tpu.memory_space<vmem>>, vector<16x128xf32>
    %c0_3 = arith.constant 0 : index
    %c0_4 = arith.constant 0 : index
    %2 = vector.load %arg3[%c0_3, %c0_4] : memref<16x1xf32, #tpu.memory_space<vmem>>, vector<16x1xf32>
    %3 = vector.broadcast %2 : vector<16x1xf32> to vector<16x128xf32>
    %4 = arith.mulf %0, %3 : vector<16x128xf32>
    %cst = arith.constant dense<0.000000e+00> : vector<128xf32>
    %5 = vector.multi_reduction <add>, %4, %cst [0] : vector<16x128xf32> to vector<128xf32>
    %6 = vector.shape_cast %5 : vector<128xf32> to vector<1x128xf32>
    %c0_5 = arith.constant 0 : index
    %c0_6 = arith.constant 0 : index
    %7 = vector.load %arg4[%c0_5, %c0_6] : memref<16x1xf32, #tpu.memory_space<vmem>>, vector<16x1xf32>
    %8 = vector.broadcast %7 : vector<16x1xf32> to vector<16x128xf32>
    %9 = arith.mulf %1, %8 : vector<16x128xf32>
    %cst_7 = arith.constant dense<0.000000e+00> : vector<128xf32>
    %10 = vector.multi_reduction <add>, %9, %cst_7 [0] : vector<16x128xf32> to vector<128xf32>
    %11 = vector.shape_cast %10 : vector<128xf32> to vector<1x128xf32>
    %12 = arith.addf %6, %11 : vector<1x128xf32>
    %c0_8 = arith.constant 0 : index
    %13 = memref.load %arg5[%c0_8] : memref<1xf32, #tpu.memory_space<smem>>
    %14 = vector.broadcast %13 : f32 to vector<1x128xf32>
    %15 = arith.addf %12, %14 : vector<1x128xf32>
    %cst_9 = arith.constant 0.000000e+00 : f32
    %16 = vector.broadcast %cst_9 : f32 to vector<1x128xf32>
    %17 = arith.subf %16, %15 : vector<1x128xf32>
    %18 = math.exp %17 : vector<1x128xf32>
    %cst_10 = arith.constant 1.000000e+00 : f32
    %19 = vector.broadcast %cst_10 : f32 to vector<1x128xf32>
    %20 = arith.addf %19, %18 : vector<1x128xf32>
    %21 = tpu.reciprocal %20 : vector<1x128xf32> -> vector<1x128xf32>
    %c0_11 = arith.constant 0 : index
    %c0_12 = arith.constant 0 : index
    %22 = vector.load %arg8[%c0_11, %c0_12] : memref<1x128xf32, #tpu.memory_space<vmem>>, vector<1x128xf32>
    tpu.vector_store %arg8[%c0_11, %c0_12], %21 {strides = array<i32>} : memref<1x128xf32, #tpu.memory_space<vmem>>, vector<1x128xf32>,
    %23 = tpu.iota {dimensions = array<i32: 1>} : vector<1x128xi32>
    %c128_i32 = arith.constant 128 : i32
    %24 = arith.muli %arg0, %c128_i32 : i32
    %25 = vector.broadcast %24 : i32 to vector<1x128xi32>
    %26 = arith.addi %23, %25 : vector<1x128xi32>
    %c0_13 = arith.constant 0 : index
    %c0_14 = arith.constant 0 : index
    %27 = vector.load %arg7[%c0_13, %c0_14] : memref<1x128xf32, #tpu.memory_space<vmem>>, vector<1x128xf32>
    %28 = arith.subf %21, %27 : vector<1x128xf32>
    %c0_15 = arith.constant 0 : index
    %29 = memref.load %arg6[%c0_15] : memref<1xi32, #tpu.memory_space<smem>>
    %30 = vector.broadcast %29 : i32 to vector<1x128xi32>
    %31 = arith.cmpi slt, %26, %30 : vector<1x128xi32>
    %32 = arith.mulf %28, %28 : vector<1x128xf32>
    %cst_16 = arith.constant 0.000000e+00 : f32
    %33 = vector.broadcast %cst_16 : f32 to vector<1x128xf32>
    %34 = arith.select %31, %32, %33 : vector<1x128xi1>, vector<1x128xf32>
    %35 = vector.shape_cast %34 : vector<1x128xf32> to vector<1x1x128xf32>
    %cst_17 = arith.constant dense<0.000000e+00> : vector<1xf32>
    %36 = vector.multi_reduction <add>, %35, %cst_17 [1, 2] : vector<1x1x128xf32> to vector<1xf32>
    %37 = vector.shape_cast %36 : vector<1xf32> to vector<1x1x1xf32>
    %38 = vector.extract %37[0, 0, 0] : f32 from vector<1x1x1xf32>
    %39 = vector.broadcast %38 : f32 to vector<1x128xf32>
    %c0_18 = arith.constant 0 : index
    %c0_19 = arith.constant 0 : index
    %40 = vector.load %arg9[%c0_18, %c0_19] : memref<1x128xf32, #tpu.memory_space<vmem>>, vector<1x128xf32>
    tpu.vector_store %arg9[%c0_18, %c0_19], %39 {strides = array<i32>} : memref<1x128xf32, #tpu.memory_space<vmem>>, vector<1x128xf32>,
    return
  }
  func.func @transform_0(%arg0: i32) -> (i32, i32) {
    %c0_i32 = arith.constant 0 : i32
    %c0_i32_0 = arith.constant 0 : i32
    return %c0_i32, %arg0 : i32, i32
  }
  func.func @transform_1(%arg0: i32) -> (i32, i32) {
    %c0_i32 = arith.constant 0 : i32
    %c0_i32_0 = arith.constant 0 : i32
    return %c0_i32, %arg0 : i32, i32
  }
  func.func @transform_2(%arg0: i32) -> (i32, i32) {
    %c0_i32 = arith.constant 0 : i32
    %c0_i32_0 = arith.constant 0 : i32
    %c0_i32_1 = arith.constant 0 : i32
    return %c0_i32, %c0_i32_0 : i32, i32
  }
  func.func @transform_3(%arg0: i32) -> (i32, i32) {
    %c0_i32 = arith.constant 0 : i32
    %c0_i32_0 = arith.constant 0 : i32
    %c0_i32_1 = arith.constant 0 : i32
    return %c0_i32, %c0_i32_0 : i32, i32
  }
  func.func @transform_4(%arg0: i32) -> i32 {
    %c0_i32 = arith.constant 0 : i32
    %c0_i32_0 = arith.constant 0 : i32
    return %c0_i32 : i32
  }
  func.func @transform_5(%arg0: i32) -> i32 {
    %c0_i32 = arith.constant 0 : i32
    %c0_i32_0 = arith.constant 0 : i32
    return %c0_i32 : i32
  }
  func.func @transform_6(%arg0: i32) -> (i32, i32) {
    %c0_i32 = arith.constant 0 : i32
    %c0_i32_0 = arith.constant 0 : i32
    return %c0_i32, %arg0 : i32, i32
  }
  func.func @transform_7(%arg0: i32) -> (i32, i32) {
    %c0_i32 = arith.constant 0 : i32
    %c0_i32_0 = arith.constant 0 : i32
    return %c0_i32, %arg0 : i32, i32
  }
  func.func @transform_8(%arg0: i32) -> (i32, i32) {
    %c0_i32 = arith.constant 0 : i32
    %c0_i32_0 = arith.constant 0 : i32
    return %c0_i32, %arg0 : i32, i32
  }
}

</mosaic_0001>

<bundles_post_ra>
// kernel: tpu_custom_call.1
= control target key start
LH: loop header
LB: loop body
LE: loop exit
PB: predicated region body
PF: predicated region fallthrough
CT: control target
= control target key end

     0   :  { %16 = vsyncpa [#allocation5], 0  ;;  %v200_v2 = vmov 0   ;;  %s305_s0 = inlined_call_operand.vmem [shape: f32[16,128], index: 0, kind: input, shape index: {}]   ;;  %s306_s1 = inlined_call_operand.vmem [shape: f32[16,128], index: 1, kind: input, shape index: {}]   ;;  %s307_s2 = inlined_call_operand.vmem [shape: f32[16,1], index: 2, kind: input, shape index: {}]   ;;  %s308_s3 = inlined_call_operand.vmem [shape: f32[16,1], index: 3, kind: input, shape index: {}]   ;;  %s309_s4 = inlined_call_operand.<no memory space> [shape: f32[1], index: 4, kind: input, shape index: {}]   ;;  %s310_s5 = inlined_call_operand.<no memory space> [shape: s32[1], index: 5, kind: input, shape index: {}]   ;;  %s311_s6 = inlined_call_operand.vmem [shape: f32[1,128], index: 6, kind: input, shape index: {}]   ;;  %s312_s7 = inlined_call_operand.hbm [shape: f32[1,128], index: 7, kind: output, shape index: {0}]   ;;  %s313_s8 = inlined_call_operand.hbm [shape: f32[1,128], index: 8, kind: output, shape index: {1}]  }
   0x1   :  { %v57_v0 = vld [vmem:[%s308_s3] sm:$0xff]  ;;  %147 = vset.pattern.permute.xlu1 %v200_v2  ;;  %146 = vset.pattern.permute.xlu0 %v200_v2 }
   0x2   :  { %v36_v1 = vld [vmem:[%s307_s2] sm:$0xff]  ;;  %61 = vperm.xlu1 %147, %v57_v0  }
   0x3   :  { %40 = vperm.xlu0 %146, %v36_v1  }
   0x4   :  { %17 = vsyncpa [#allocation7], 0  ;;  %v58_v3 = vld [vmem:[%s308_s3 + $0x8] sm:$0xff]  ;;  %v34_v7 = vld [vmem:[%s306_s1] sm:$0xff]  ;;  %v80_v31 = vstv %s309_s4  ;;  %v88_v38 = vlaneseq  ;;  %v96_v41 = vstv %s310_s5  ;;  %vm100_vm1 = vcmask 1040384   ;;  %s201_s4 = smov [#allocation4]  }
   0x5   :  { %v37_v4 = vld [vmem:[%s307_s2 + $0x8] sm:$0xff]  ;;  %v32_v8 = vld [vmem:[%s305_s0] sm:$0xff]  ;;  %s119_s23 = sshll.u32 %s201_s4, 4  ;;  %s120_s23 = int_to_ptr.vmem [resolvable:$true] %s119_s23 }
   0x6   :  { %66 = vperm.xlu1 %147, %v58_v3   ;;  %v35_v9 = vld [vmem:[%s306_s1 + $0x8] sm:$0xff]  ;;  %v89_v39 = vand.u32 127, %v88_v38  ;;  %v93_v40 = vld [vmem:[%s311_s6] sm:$0x1]  ;;  %s152_s24 = scalar_lea.vmem %s120_s23, 16  ;;  %s156_s25 = scalar_lea.vmem %s120_s23, 32 }
   0x7   :  { %45 = vperm.xlu0 %146, %v37_v4   ;;  %v33_v10 = vld [vmem:[%s305_s0 + $0x8] sm:$0xff]  ;;  %p153_p0 = scmp.ne.s32.totalorder %s120_s23, %s152_s24  ;;  %p157_p1 = scmp.lt.s32.totalorder %s120_s23, %s120_s23 }
   0x8   :  { %vm97_vm0 = vcmp.lt.s32.totalorder %v89_v39, %v96_v41  ;;  %p158_p2 = scmp.lt.s32.totalorder %s156_s25, %s152_s24 }
   0xa   :  { %p159_p3 = por %p158_p2, %p157_p1 }
   0xc   :  { %p160_p4 = pnand %p159_p3, %p153_p0 }
  0x81   :  { %v62_v5 = vpop.permute.xlu1 %61 }
  0x82   :  { %v41_v6 = vpop.permute.xlu0 %40  ;;  %v69_v13 = vmul.f32 %v62_v5, %v34_v7 }
  0x83   :  { %v48_v14 = vmul.f32 %v41_v6, %v32_v8 }
  0x85   :  { %v67_v11 = vpop.permute.xlu1 %66 }
  0x86   :  { %v46_v12 = vpop.permute.xlu0 %45  ;;  %v70_v15 = vmul.f32 %v67_v11, %v35_v9 }
  0x87   :  { %v49_v16 = vmul.f32 %v46_v12, %v33_v10 }
  0x88   :  { %v71_v17 = vadd.f32 %v70_v15, %v69_v13 }
  0x89   :  { %v50_v18 = vadd.f32 %v49_v16, %v48_v14 }
  0x8a   :  { %v72_v19 = vrot.slane %v71_v17, 4 }
  0x8b   :  { %v51_v20 = vrot.slane %v50_v18, 4 }
  0x8c   :  { %v73_v21 = vadd.f32 %v72_v19, %v71_v17 }
  0x8d   :  { %v52_v22 = vadd.f32 %v51_v20, %v50_v18 }
  0x8e   :  { %v74_v23 = vrot.slane %v73_v21, 2 }
  0x8f   :  { %v53_v24 = vrot.slane %v52_v22, 2 }
  0x90   :  { %v75_v25 = vadd.f32 %v74_v23, %v73_v21 }
  0x91   :  { %v54_v26 = vadd.f32 %v53_v24, %v52_v22 }
  0x92   :  { %v76_v27 = vrot.slane %v75_v25, 1 }
  0x93   :  { %v55_v28 = vrot.slane %v54_v26, 1 }
  0x94   :  { %v77_v29 = vadd.f32 %v76_v27, %v75_v25 }
  0x95   :  { %v56_v30 = vadd.f32 %v55_v28, %v54_v26 }
  0x97   :  { %v78_v32 = vadd.f32 %v77_v29, %v56_v30 }
  0x99   :  { %v81_v33 = vadd.f32 %v80_v31, %v78_v32 }
  0x9b   :  { %v82_v34 = vsub.f32 0.0, %v81_v33 }
  0x9d   :  { %v83_v35 = vmul.f32 1.442695, %v82_v34 }
  0x9f   :  { %148 = vpow2.f32 %v83_v35 }
  0xa9   :  { %v149_v36 = vpop.eup %148 }
  0xaa   :  { %v85_v37 = vadd.f32 1.0, %v149_v36 }
  0xac   :  { %150 = vrcp.f32 %v85_v37 }
  0xb6   :  { %v151_v42 = vpop.eup %150 }
  0xb7   :  { %v94_v43 = vsub.f32 %v151_v42, %v93_v40  ;;  %87 = vst [vmem:[#allocation4] sm:$0x1] %v151_v42 }
  0xb9   :  { %v98_v44 = vmul.f32 %v94_v43, %v94_v43 }
  0xbb   :  { %v99_v45 = vsel %vm97_vm0, %v98_v44, 0.0 }
  0xbc   :  { %v101_v46 = vsel %vm100_vm1, %v99_v45, 0.0 }
  0xbd   :  { %102 = vadd.xlane.f32.xlu0 %v101_v46 }
  0xbe   :  { %163 = shalt.err (!%p160_p4)
}
  0xbf   :  { %s164_s26 = scalar_lea.hbm %s312_s7, 16 }
  0xc0   :  { %p165_p5 = scmp.ne.s32.totalorder %s312_s7, %s164_s26  ;;  %p168_p6 = scmp.lt.u32.totalorder %s164_s26, %s312_s7 }
  0xc2   :  { %p170_p7 = pnand %p168_p6, %p165_p5 }
  0xc4   :  { %173 = shalt.err (!%p170_p7)
}
  0xc5   :  { %122 = dma.vmem_to_hbm [thread:$0]  %s120_s23, 16, %s312_s7, [#allocation5]  }
  0xc6   :  { %s202_s11 = smov [#allocation6]  }
  0xc7   :  { %s129_s12 = sshll.u32 %s202_s11, 4  ;;  %s130_s12 = int_to_ptr.vmem [resolvable:$true] %s129_s12 }
  0xc8   :  { %s174_s14 = scalar_lea.vmem %s130_s12, 16  ;;  %s178_s15 = scalar_lea.vmem %s130_s12, 32 }
  0xc9   :  { %p175_p8 = scmp.ne.s32.totalorder %s130_s12, %s174_s14  ;;  %p179_p9 = scmp.lt.s32.totalorder %s130_s12, %s130_s12 }
  0xca   :  { %p180_p10 = scmp.lt.s32.totalorder %s178_s15, %s174_s14 }
  0xcc   :  { %p181_p11 = por %p180_p10, %p179_p9 }
  0xce   :  { %p182_p12 = pnand %p181_p11, %p175_p8 }
 0x14a   :  { %v103_v47 = vpop.xlane.xlu0 %102 }
 0x14b   :  { %v104_v48 = vrot.slane %v103_v47, 4 }
 0x14d   :  { %v105_v49 = vadd.f32 %v104_v48, %v103_v47 }
 0x14f   :  { %v106_v50 = vrot.slane %v105_v49, 2 }
 0x151   :  { %v107_v51 = vadd.f32 %v106_v50, %v105_v49 }
 0x153   :  { %v108_v52 = vrot.slane %v107_v51, 1 }
 0x155   :  { %v109_v53 = vadd.f32 %v108_v52, %v107_v51 }
 0x157   :  { %141 = vpush %v109_v53 }
 0x188   :  { %s142_s13 = spop %141 }
 0x189   :  { %v111_v54 = vstv %s142_s13 }
 0x18a   :  { %112 = vst [vmem:[#allocation6] sm:$0x1] %v111_v54 }
 0x18b   :  { %185 = shalt.err (!%p182_p12)
}
 0x18c   :  { %s186_s17 = scalar_lea.hbm %s313_s8, 16 }
 0x18d   :  { %p187_p13 = scmp.ne.s32.totalorder %s313_s8, %s186_s17  ;;  %p190_p0 = scmp.lt.u32.totalorder %s186_s17, %s313_s8 }
 0x18f   :  { %p192_p1 = pnand %p190_p0, %p187_p13 }
 0x191   :  { %195 = shalt.err (!%p192_p1)
}
 0x192   :  { %132 = dma.vmem_to_hbm [thread:$0]  %s130_s12, 16, %s313_s8, [#allocation7]  }
 0x193   :  { %196 = dma.done.wait [#allocation5], 16  }
 0x194   :  { %197 = vsyncadd [#allocation5], 4294967280 }
 0x195   :  { %198 = dma.done.wait [#allocation7], 16  }
 0x196   :  { %199 = vsyncadd [#allocation7], 4294967280 }
 0x197   :  { %139 = vsyncpa [#allocation5], 1 }
 0x198   :  { %140 = vsyncpa [#allocation7], 1 }

</bundles_post_ra>
